<compile_context>
chip_gen: v7x
topology: tpu7x:2x2x1
jax: 0.10.0
libtpu: 0.0.40
codegen_flags: <defaults>
</compile_context>

<pallas_src>
import jax
import jax.numpy as jnp
from jax.experimental import pallas as pl
from jax.experimental.pallas import tpu as pltpu

# ----- synthetic config (matches the shapes implied by Model.__init__) -----
N_VOCAB        = 32
EMBED          = 32
SEQ_LEN        = 16
NUM_FILTERS    = 8
FILTER_SIZES   = (2, 3, 4)
NUM_CLASSES    = 4
BATCH          = 2
BATCH_TILE_MAX = 16    # per-grid-step batch rows; 16*T_pad=256 matmul rows
                       # saturates the MXU M dim at production batch sizes.
C_PAD          = 128   # lane-dense logits block (sliced back to NUM_CLASSES)


def textcnn_kernel(win_ref, w_ref, b_ref, mask_ref, fcw_ref, fcb_ref, out_ref):
    """One grid step = one batch tile.

    win_ref  : (TB, T_pad, k_max*E) bf16  unfolded embedding windows
    w_ref    : (k_max*E, F)         bf16  all conv filters, zero-padded, pre-T
    b_ref    : (1, F)               f32   all conv biases
    mask_ref : (T_pad, F)           f32   1.0 valid window, 0.0 padded tail
    fcw_ref  : (F, C_PAD)           bf16  fc weight, pre-T, zero-padded lanes
    fcb_ref  : (1, C_PAD)           f32   fc bias, zero-padded lanes
    out_ref  : (TB, C_PAD)          f32   lane-dense logits
    """
    tb, t, k = win_ref.shape
    f = w_ref.shape[1]

    # (TB*T_pad, 128) — both dims (8,128)-aligned, so this reshape is free.
    win = win_ref[...].reshape(tb * t, k)
    # Fused conv for all filter sizes: one K=128 bf16 MXU contraction, f32 acc.
    conv = jnp.dot(win, w_ref[...], preferred_element_type=jnp.float32)
    conv = jnp.maximum(conv + b_ref[...], 0.0)                 # bias + ReLU (f32)
    # Zero windows past each filter's valid range (and the T padding row).
    # Post-ReLU the valid max is >= 0, so a 0/1 mask is exact.
    conv = conv.reshape(tb, t, f) * mask_ref[...]              # (TB, T_pad, F)
    feat = jnp.max(conv, axis=1)                               # (TB, F) max-over-time
    # dropout is identity at inference; final FC as one lane-dense matmul.
    logits = jnp.dot(feat.astype(fcw_ref.dtype), fcw_ref[...],
                     preferred_element_type=jnp.float32) + fcb_ref[...]
    out_ref[...] = logits.astype(out_ref.dtype)                # (TB, 128) vst, no mask


def text_cnn_forward(token_ids, params):
    B, S = token_ids.shape
    n = len(FILTER_SIZES)
    k_max = max(FILTER_SIZES)
    k_min = min(FILTER_SIZES)
    T = S - k_min + 1                         # window count shared by all filters
    T_pad = ((T + 7) // 8) * 8                # sublane-align window axis (15 -> 16)
    F_total = NUM_FILTERS * n
    K = k_max * EMBED                         # 4*32 = 128 contraction lanes

    # --- glue (plain JAX): embedding gather + window unfold + weight fusion ---
    emb = params["embedding"][token_ids].astype(jnp.float32)       # (B, S, E)
    pad_s = (T_pad - 1 + k_max) - S                                # zero rows past S
    emb_pad = jnp.pad(emb, ((0, 0), (0, pad_s), (0, 0)))
    # win[b, t, j*E:(j+1)*E] = emb_pad[b, t+j, :]  -> (B, T_pad, k_max*E)
    win = jnp.concatenate([emb_pad[:, j:j + T_pad, :] for j in range(k_max)],
                          axis=-1).astype(jnp.bfloat16)

    # Fuse all conv filters: (K, F_total) weight, (1, F_total) bias,
    # (T_pad, F_total) validity mask. All layout plumbing done host-side.
    w_cols, b_cols, m_cols = [], [], []
    for i, k in enumerate(FILTER_SIZES):
        w_t = params["conv_w"][i].T                                # (k*E, nf)
        w_cols.append(jnp.pad(w_t, ((0, (k_max - k) * EMBED), (0, 0))))
        b_cols.append(params["conv_b"][i])                         # (1, nf)
        valid = (jnp.arange(T_pad) < (S - k + 1)).astype(jnp.float32)
        m_cols.append(jnp.broadcast_to(valid[:, None], (T_pad, NUM_FILTERS)))
    w_all = jnp.concatenate(w_cols, axis=1).astype(jnp.bfloat16)   # (K, F_total)
    b_all = jnp.concatenate(b_cols, axis=1)                        # (1, F_total) f32
    mask = jnp.concatenate(m_cols, axis=1)                         # (T_pad, F_total)

    # FC weight/bias, pre-transposed and zero-padded to a lane-dense 128 cols.
    fc_wt = jnp.pad(params["fc_w"].T,
                    ((0, 0), (0, C_PAD - NUM_CLASSES))).astype(jnp.bfloat16)
    fc_b = jnp.pad(params["fc_b"], ((0, 0), (0, C_PAD - NUM_CLASSES)))

    # Batch tiling: whole (small) batch in one step; cdiv + zero-pad otherwise.
    tb = min(B, BATCH_TILE_MAX)
    B_pad = pl.cdiv(B, tb) * tb
    if B_pad != B:
        win = jnp.pad(win, ((0, B_pad - B), (0, 0), (0, 0)))
    grid = (B_pad // tb,)

    out = pl.pallas_call(
        textcnn_kernel,
        out_shape=jax.ShapeDtypeStruct((B_pad, C_PAD), jnp.float32),
        grid=grid,
        in_specs=[
            pl.BlockSpec((tb, T_pad, K), lambda i: (i, 0, 0)),        # windows
            pl.BlockSpec((K, F_total), lambda i: (0, 0)),             # conv weight
            pl.BlockSpec((1, F_total), lambda i: (0, 0)),             # conv bias
            pl.BlockSpec((T_pad, F_total), lambda i: (0, 0)),         # validity mask
            pl.BlockSpec((F_total, C_PAD), lambda i: (0, 0)),         # fc weight^T
            pl.BlockSpec((1, C_PAD), lambda i: (0, 0)),               # fc bias
        ],
        out_specs=pl.BlockSpec((tb, C_PAD), lambda i: (i, 0)),        # lane-dense
        compiler_params=pltpu.CompilerParams(
            dimension_semantics=("parallel",)),                       # megacore
    )(win, w_all, b_all, mask, fc_wt, fc_b)
    return out[:B, :NUM_CLASSES]                                      # (B, C)


def ref_forward(token_ids, params):
    """Pure-JAX f32 reference of the PyTorch forward (labels=None path)."""
    emb = params["embedding"][token_ids].astype(jnp.float32)          # (B, S, E)
    feats = []
    for i, k in enumerate(FILTER_SIZES):
        w = params["conv_w"][i].reshape(NUM_FILTERS, k, EMBED)        # (nf, k, E)
        b = params["conv_b"][i][0]                                    # (nf,)
        t_k = SEQ_LEN - k + 1
        conv = sum(jnp.einsum("bte,fe->btf", emb[:, j:j + t_k, :], w[:, j, :])
                   for j in range(k)) + b                             # (B, T_k, nf)
        conv = jnp.maximum(conv, 0.0)
        feats.append(jnp.max(conv, axis=1))                           # (B, nf)
    feat = jnp.concatenate(feats, axis=1)                             # (B, nf*n)
    return feat @ params["fc_w"].T + params["fc_b"][0]


def init_params(key):
    keys = jax.random.split(key, 3 + 2 * len(FILTER_SIZES))
    emb_table = 0.1 * jax.random.normal(keys[0], (N_VOCAB, EMBED), jnp.float32)
    emb_table = emb_table.at[N_VOCAB - 1].set(0.0)   # padding_idx row init to 0
    conv_w, conv_b = [], []
    for i, k in enumerate(FILTER_SIZES):
        conv_w.append(0.1 * jax.random.normal(keys[1 + 2 * i],
                                              (NUM_FILTERS, k * EMBED),
                                              jnp.float32))
        conv_b.append(0.1 * jax.random.normal(keys[2 + 2 * i],
                                              (1, NUM_FILTERS), jnp.float32))
    fc_w = 0.1 * jax.random.normal(keys[-2],
                                   (NUM_CLASSES, NUM_FILTERS * len(FILTER_SIZES)),
                                   jnp.float32)
    fc_b = 0.1 * jax.random.normal(keys[-1], (1, NUM_CLASSES), jnp.float32)
    return {"embedding": emb_table, "conv_w": conv_w, "conv_b": conv_b,
            "fc_w": fc_w, "fc_b": fc_b}


if __name__ == "__main__":
    key = jax.random.PRNGKey(0)
    pkey, dkey = jax.random.split(key)
    params = init_params(pkey)
    token_ids = jax.random.randint(dkey, (BATCH, SEQ_LEN), 0, N_VOCAB,
                                   dtype=jnp.int32)

    out = jax.block_until_ready(text_cnn_forward(token_ids, params))
    ref = ref_forward(token_ids, params)

    assert out.shape == (BATCH, NUM_CLASSES)
    # Tolerance accounts for bf16 rounding of the matmul operands (f32 accum);
    # expected deviation vs. the pure-f32 reference is ~1e-3 at these scales.
    assert jnp.allclose(out, ref, atol=2e-2, rtol=2e-2), (out, ref)
    print("KERNEL_OK")
</pallas_src>

<mosaic_0001>
module attributes {stable_mosaic.version = 11 : i64} {
  func.func @textcnn_kernel(%arg0: i32, %arg1: memref<2x16x128xbf16, #tpu.memory_space<vmem>>, %arg2: memref<128x24xbf16, #tpu.memory_space<vmem>>, %arg3: memref<1x24xf32, #tpu.memory_space<vmem>>, %arg4: memref<16x24xf32, #tpu.memory_space<vmem>>, %arg5: memref<24x128xbf16, #tpu.memory_space<vmem>>, %arg6: memref<1x128xf32, #tpu.memory_space<vmem>>, %arg7: memref<2x128xf32, #tpu.memory_space<vmem>>) attributes {dimension_semantics = [#tpu.dimension_semantics<parallel>], iteration_bounds = array<i64: 1>, scalar_prefetch = 0 : i64, scratch_operands = 0 : i64, tpu.core_type = #tpu.core_type<tc>, window_params = [{transform_indices = @transform_0, window_bounds = array<i64: 2, 16, 128>}, {pipeline_mode = #tpu.pipeline_mode<synchronous>, transform_indices = @transform_1, window_bounds = array<i64: 128, 24>}, {pipeline_mode = #tpu.pipeline_mode<synchronous>, transform_indices = @transform_2, window_bounds = array<i64: 1, 24>}, {pipeline_mode = #tpu.pipeline_mode<synchronous>, transform_indices = @transform_3, window_bounds = array<i64: 16, 24>}, {pipeline_mode = #tpu.pipeline_mode<synchronous>, transform_indices = @transform_4, window_bounds = array<i64: 24, 128>}, {pipeline_mode = #tpu.pipeline_mode<synchronous>, transform_indices = @transform_5, window_bounds = array<i64: 1, 128>}, {transform_indices = @transform_6, window_bounds = array<i64: 2, 128>}]} {
    %c0 = arith.constant 0 : index
    %c0_0 = arith.constant 0 : index
    %c0_1 = arith.constant 0 : index
    %0 = vector.load %arg1[%c0, %c0_0, %c0_1] : memref<2x16x128xbf16, #tpu.memory_space<vmem>>, vector<2x16x128xbf16>
    %1 = vector.shape_cast %0 : vector<2x16x128xbf16> to vector<32x128xbf16>
    %c0_2 = arith.constant 0 : index
    %c0_3 = arith.constant 0 : index
    %2 = vector.load %arg2[%c0_2, %c0_3] : memref<128x24xbf16, #tpu.memory_space<vmem>>, vector<128x24xbf16>
    %cst = arith.constant dense<0.000000e+00> : vector<32x24xf32>
    %3 = tpu.matmul %1, %2, %cst {dimension_numbers = #tpu.dot_dimension_numbers<[1], [0], [0], [1], [0, 0, 1, 1], [], []>} : vector<32x128xbf16>, vector<128x24xbf16>, vector<32x24xf32> -> vector<32x24xf32>
    %c0_4 = arith.constant 0 : index
    %c0_5 = arith.constant 0 : index
    %4 = vector.load %arg3[%c0_4, %c0_5] : memref<1x24xf32, #tpu.memory_space<vmem>>, vector<1x24xf32>
    %5 = vector.broadcast %4 : vector<1x24xf32> to vector<32x24xf32>
    %6 = arith.addf %3, %5 : vector<32x24xf32>
    %cst_6 = arith.constant 0.000000e+00 : f32
    %7 = vector.broadcast %cst_6 : f32 to vector<32x24xf32>
    %8 = arith.maximumf %6, %7 : vector<32x24xf32>
    %9 = vector.shape_cast %8 : vector<32x24xf32> to vector<2x16x24xf32>
    %c0_7 = arith.constant 0 : index
    %c0_8 = arith.constant 0 : index
    %10 = vector.load %arg4[%c0_7, %c0_8] : memref<16x24xf32, #tpu.memory_space<vmem>>, vector<16x24xf32>
    %11 = vector.shape_cast %10 : vector<16x24xf32> to vector<1x16x24xf32>
    %12 = vector.broadcast %11 : vector<1x16x24xf32> to vector<2x16x24xf32>
    %13 = arith.mulf %9, %12 : vector<2x16x24xf32>
    %cst_9 = arith.constant dense<0xFF800000> : vector<2x24xf32>
    %14 = vector.multi_reduction <maximumf>, %13, %cst_9 [1] : vector<2x16x24xf32> to vector<2x24xf32>
    %15 = arith.truncf %14 : vector<2x24xf32> to vector<2x24xbf16>
    %c0_10 = arith.constant 0 : index
    %c0_11 = arith.constant 0 : index
    %16 = vector.load %arg5[%c0_10, %c0_11] : memref<24x128xbf16, #tpu.memory_space<vmem>>, vector<24x128xbf16>
    %cst_12 = arith.constant dense<0.000000e+00> : vector<2x128xf32>
    %17 = tpu.matmul %15, %16, %cst_12 {dimension_numbers = #tpu.dot_dimension_numbers<[1], [0], [0], [1], [0, 0, 1, 1], [], []>} : vector<2x24xbf16>, vector<24x128xbf16>, vector<2x128xf32> -> vector<2x128xf32>
    %c0_13 = arith.constant 0 : index
    %c0_14 = arith.constant 0 : index
    %18 = vector.load %arg6[%c0_13, %c0_14] : memref<1x128xf32, #tpu.memory_space<vmem>>, vector<1x128xf32>
    %19 = vector.broadcast %18 : vector<1x128xf32> to vector<2x128xf32>
    %20 = arith.addf %17, %19 : vector<2x128xf32>
    %c0_15 = arith.constant 0 : index
    %c0_16 = arith.constant 0 : index
    %21 = vector.load %arg7[%c0_15, %c0_16] : memref<2x128xf32, #tpu.memory_space<vmem>>, vector<2x128xf32>
    tpu.vector_store %arg7[%c0_15, %c0_16], %20 {strides = array<i32>} : memref<2x128xf32, #tpu.memory_space<vmem>>, vector<2x128xf32>,
    return
  }
  func.func @transform_0(%arg0: i32) -> (i32, i32, i32) {
    %c0_i32 = arith.constant 0 : i32
    %c0_i32_0 = arith.constant 0 : i32
    %c0_i32_1 = arith.constant 0 : i32
    return %arg0, %c0_i32, %c0_i32_0 : i32, i32, i32
  }
  func.func @transform_1(%arg0: i32) -> (i32, i32) {
    %c0_i32 = arith.constant 0 : i32
    %c0_i32_0 = arith.constant 0 : i32
    %c0_i32_1 = arith.constant 0 : i32
    return %c0_i32, %c0_i32_0 : i32, i32
  }
  func.func @transform_2(%arg0: i32) -> (i32, i32) {
    %c0_i32 = arith.constant 0 : i32
    %c0_i32_0 = arith.constant 0 : i32
    %c0_i32_1 = arith.constant 0 : i32
    return %c0_i32, %c0_i32_0 : i32, i32
  }
  func.func @transform_3(%arg0: i32) -> (i32, i32) {
    %c0_i32 = arith.constant 0 : i32
    %c0_i32_0 = arith.constant 0 : i32
    %c0_i32_1 = arith.constant 0 : i32
    return %c0_i32, %c0_i32_0 : i32, i32
  }
  func.func @transform_4(%arg0: i32) -> (i32, i32) {
    %c0_i32 = arith.constant 0 : i32
    %c0_i32_0 = arith.constant 0 : i32
    %c0_i32_1 = arith.constant 0 : i32
    return %c0_i32, %c0_i32_0 : i32, i32
  }
  func.func @transform_5(%arg0: i32) -> (i32, i32) {
    %c0_i32 = arith.constant 0 : i32
    %c0_i32_0 = arith.constant 0 : i32
    %c0_i32_1 = arith.constant 0 : i32
    return %c0_i32, %c0_i32_0 : i32, i32
  }
  func.func @transform_6(%arg0: i32) -> (i32, i32) {
    %c0_i32 = arith.constant 0 : i32
    %c0_i32_0 = arith.constant 0 : i32
    return %arg0, %c0_i32 : i32, i32
  }
}

</mosaic_0001>

<bundles_post_ra>
// kernel: tpu_custom_call.1
= control target key start
LH: loop header
LB: loop body
LE: loop exit
PB: predicated region body
PF: predicated region fallthrough
CT: control target
= control target key end

     0   :  { %s478_s0 = inlined_call_operand.vmem [shape: bf16[2,16,128], index: 0, kind: input, shape index: {}]   ;;  %s479_s1 = inlined_call_operand.vmem [shape: bf16[128,24], index: 1, kind: input, shape index: {}]   ;;  %s480_s2 = inlined_call_operand.vmem [shape: f32[1,24], index: 2, kind: input, shape index: {}]   ;;  %s481_s3 = inlined_call_operand.vmem [shape: f32[16,24], index: 3, kind: input, shape index: {}]   ;;  %s482_s4 = inlined_call_operand.vmem [shape: bf16[24,128], index: 4, kind: input, shape index: {}]   ;;  %s483_s5 = inlined_call_operand.vmem [shape: f32[1,128], index: 5, kind: input, shape index: {}]   ;;  %s484_s6 = inlined_call_operand.hbm [shape: f32[2,128], index: 6, kind: output, shape index: {}]  }
   0x1   :  { %v339_v0 = vld [vmem:[%s479_s1] sm:$0xff]   ;;  %v340_v1 = vld [vmem:[%s479_s1 + $0x8] sm:$0xff]   ;;  %v341_v2 = vld [vmem:[%s479_s1 + $0x10] sm:$0xff]  }
   0x2   :  { %308 = vmatprep.subr.bf16.mxu0 %v339_v0  ;;  %v342_v3 = vld [vmem:[%s479_s1 + $0x18] sm:$0xff]   ;;  %v347_v4 = vld [vmem:[%s478_s0] sm:$0xff]  }
   0x3   :  { %309 = vmatpush3.bf16.msra.mxu0 %v339_v0  ;;  %324 = vmatprep.mubr.bf16.mxu0 %v347_v4 }
   0x4   :  { %310 = vmatprep.subr.bf16.mxu0 %v340_v1 }
   0x7   :  { %311 = vmatpush3.bf16.msra.mxu0 %v340_v1 }
   0x8   :  { %312 = vmatprep.subr.bf16.mxu0 %v341_v2 }
   0xb   :  { %313 = vmatpush3.bf16.msra.mxu0 %v341_v2 }
   0xc   :  { %11 = vsyncpa [#allocation3], 0  ;;  %314 = vmatprep.subr.bf16.mxu0 %v342_v3  ;;  %v343_v5 = vld [vmem:[%s479_s1 + $0x20] sm:$0xff]   ;;  %v344_v6 = vld [vmem:[%s479_s1 + $0x28] sm:$0xff]   ;;  %v375_v11 = vmov 0.0   ;;  %vm221_vm0 = vcmask 1043456  }
   0xd   :  { %v345_v7 = vld [vmem:[%s479_s1 + $0x30] sm:$0xff]   ;;  %v346_v8 = vld [vmem:[%s479_s1 + $0x38] sm:$0xff]   ;;  %v348_v9 = vld [vmem:[%s478_s0 + $0x8] sm:$0xff]   ;;  %328 = vmatprep.subr.bf16.mxu1 %v375_v11  ;;  %vm376_vm1 = vmmov 0   ;;  %vm171_vm2 = vcmask 195584   ;;  %vm206_vm3 = vcmask 1041409  }
   0xe   :  { %v349_v10 = vld [vmem:[%s482_s4] sm:$0xff]   ;;  %v350_v12 = vld [vmem:[%s482_s4 + $0x8] ss:$0 sps:$4 sm:$0xff]   ;;  %332 = vmatprep.mubr.msk.bf16.mxu1 %vm376_vm1, %v375_v11  ;;  %s377_s24 = smov [#allocation2]  }
   0xf   :  { %315 = vmatpush3.bf16.msra.mxu0 %v342_v3  ;;  %329 = vmatpush3.bf16.msra.mxu1 %v349_v10  ;;  %v223_v13 = vsel %vm221_vm0, %v350_v12, 0  ;;  %v280_v14 = vld [vmem:[%s480_s2] ss:$0 sm:$0xff]  ;;  %v166_v25 = vld [vmem:[%s481_s3 + $0x8] sm:$0xff]  ;;  %s272_s25 = sshll.u32 %s377_s24, 4  ;;  %s273_s25 = int_to_ptr.vmem [resolvable:$true] %s272_s25 }
  0x10   :  { %316 = vmatprep.subr.bf16.mxu0 %v343_v5  ;;  %330 = vmatprep.subr.bf16.mxu1 %v375_v11  ;;  %v165_v18 = vld [vmem:[%s481_s3] sm:$0xff]  ;;  %s351_s26 = scalar_lea.vmem %s273_s25, 32  ;;  %p356_p1 = scmp.lt.s32.totalorder %s273_s25, %s273_s25 }
  0x11   :  { %v291_v57 = vld [vmem:[%s483_s5] ss:$0 sm:$0xff]  ;;  %p352_p0 = scmp.ne.s32.totalorder %s273_s25, %s351_s26  ;;  %p357_p2 = scmp.lt.s32.totalorder %s351_s26, %s351_s26 }
  0x13   :  { %317 = vmatpush3.bf16.msra.mxu0 %v343_v5  ;;  %331 = vmatpush3.bf16.msra.mxu1 %v223_v13  ;;  %p358_p3 = por %p357_p2, %p356_p1 }
  0x14   :  { %318 = vmatprep.subr.bf16.mxu0 %v344_v6 }
  0x15   :  { %p359_p4 = pnand %p358_p3, %p352_p0 }
  0x17   :  { %319 = vmatpush3.bf16.msra.mxu0 %v344_v6 }
  0x18   :  { %320 = vmatprep.subr.bf16.mxu0 %v345_v7 }
  0x1b   :  { %321 = vmatpush3.bf16.msra.mxu0 %v345_v7 }
  0x1c   :  { %322 = vmatprep.subr.bf16.mxu0 %v346_v8 }
  0x1f   :  { %323 = vmatpush3.bf16.msra.mxu0 %v346_v8 }
  0x22   :  { %325 = vmatmul.mubr.bf16.vlgmr.msra.gmra.mrb[0].mxu0 %v348_v9 }
  0xf5   :  { %v326_v15 = vpop.f32.mrb[0].mxu0 }
  0xf6   :  { %v155_v16 = vadd.f32 %v326_v15, %v280_v14  ;;  %v146_v17 = vpop.f32.mrb[1].mxu0 }
  0xf7   :  { %v147_v19 = vadd.f32 %v280_v14, %v146_v17  ;;  %v327_v20 = vpop.f32.mrb[2].mxu0 }
  0xf8   :  { %v163_v21 = vmax.f32 %v155_v16, 0.0  ;;  %v158_v22 = vadd.f32 %v327_v20, %v280_v14  ;;  %v149_v23 = vpop.f32.mrb[3].mxu0 }
  0xf9   :  { %v161_v24 = vmax.f32 %v147_v19, 0.0  ;;  %v150_v26 = vadd.f32 %v280_v14, %v149_v23 }
  0xfa   :  { %v169_v27 = vmul.f32 %v165_v18, %v163_v21  ;;  %v164_v28 = vmax.f32 %v158_v22, 0.0 }
  0xfb   :  { %v167_v29 = vmul.f32 %v165_v18, %v161_v24  ;;  %v162_v30 = vmax.f32 %v150_v26, 0.0 }
  0xfc   :  { %v170_v31 = vmul.f32 %v166_v25, %v164_v28  ;;  %v181_v33 = vsel %vm171_vm2, %v169_v27, -inf }
  0xfd   :  { %v168_v32 = vmul.f32 %v166_v25, %v162_v30  ;;  %v172_v35 = vsel %vm171_vm2, %v167_v29, -inf }
  0xfe   :  { %v182_v34 = vsel %vm171_vm2, %v170_v31, -inf }
  0xff   :  { %v183_v36 = vmax.f32 %v181_v33, %v182_v34  ;;  %v173_v37 = vsel %vm171_vm2, %v168_v32, -inf }
 0x100   :  { %v174_v38 = vmax.f32 %v172_v35, %v173_v37 }
 0x101   :  { %v184_v39 = vrot.slane %v183_v36, 4 }
 0x102   :  { %v175_v40 = vrot.slane %v174_v38, 4 }
 0x103   :  { %v185_v41 = vmax.f32 %v183_v36, %v184_v39 }
 0x104   :  { %v176_v42 = vmax.f32 %v174_v38, %v175_v40 }
 0x105   :  { %v186_v43 = vrot.slane %v185_v41, 2 }
 0x106   :  { %v177_v44 = vrot.slane %v176_v42, 2 }
 0x107   :  { %v187_v45 = vmax.f32 %v185_v41, %v186_v43 }
 0x108   :  { %v178_v46 = vmax.f32 %v176_v42, %v177_v44 }
 0x109   :  { %v188_v47 = vrot.slane %v187_v45, 1 }
 0x10a   :  { %v179_v48 = vrot.slane %v178_v46, 1 }
 0x10b   :  { %v189_v49 = vmax.f32 %v187_v45, %v188_v47 }
 0x10c   :  { %v180_v50 = vmax.f32 %v178_v46, %v179_v48 }
 0x10d   :  { %v191_v51 = vpack.c.bf16 %v189_v49, %v189_v49 }
 0x10e   :  { %v190_v52 = vpack.c.bf16 %v180_v50, %v180_v50 }
 0x10f   :  { %v205_v53 = vunpack.c.l.b16 %v191_v51 }
 0x110   :  { %v204_v54 = vunpack.c.l.b16 %v190_v52 }
 0x112   :  { %v207_v55 = vsel %vm206_vm3, %v205_v53, %v204_v54 }
 0x113   :  { %v208_v56 = vpack.c.b16 %v207_v55, %v207_v55 }
 0x115   :  { %333 = vmatmul.mubr.msk.bf16.vlgmr.msra.gmra.mrb[0].mxu1 %vm171_vm2, %v208_v56 }
 0x1e8   :  { %v259_v58 = vpop.f32.mrb[0].mxu1 }
 0x1e9   :  { %v260_v59 = vadd.f32 %v291_v57, %v259_v58  ;;  %v334_v60 = vpop.f32.mrb[1].mxu1 }
 0x1ea   :  { %v262_v61 = vpop.f32.mrb[2].mxu1 }
 0x1eb   :  { %265 = vst [vmem:[#allocation2] sm:$0x3] %v260_v59  ;;  %v335_v62 = vpop.f32.mrb[3].mxu1 }
 0x1ec   :  { %362 = shalt.err (!%p359_p4)
}
 0x1ed   :  { %s363_s5 = scalar_lea.hbm %s484_s6, 32 }
 0x1ee   :  { %p364_p5 = scmp.ne.s32.totalorder %s484_s6, %s363_s5  ;;  %p367_p6 = scmp.lt.u32.totalorder %s363_s5, %s484_s6 }
 0x1f0   :  { %p369_p7 = pnand %p367_p6, %p364_p5 }
 0x1f2   :  { %372 = shalt.err (!%p369_p7)
}
 0x1f3   :  { %275 = dma.vmem_to_hbm [thread:$0]  %s273_s25, 32, %s484_s6, [#allocation3]  }
 0x1f4   :  { %373 = dma.done.wait [#allocation3], 32  }
 0x1f5   :  { %374 = vsyncadd [#allocation3], 4294967264 }
 0x1f6   :  { %279 = vsyncpa [#allocation3], 1 }

</bundles_post_ra>
